<compile_context>
chip_gen: v7x
topology: tpu7x:2x2x1
jax: 0.10.0
libtpu: 0.0.40
codegen_flags: <defaults>
</compile_context>

<pallas_src>
import functools
import math

import jax
import jax.numpy as jnp
from jax.experimental import pallas as pl
from jax.experimental.pallas import tpu as pltpu


def _gfp_kernel_cols(x_ref, w_ref, out_ref, *, nj_half):
    # 2-D grid: axis 0 = row tiles, axis 1 = column tiles over [sin-half | cos-half].
    # x_ref:   (TB, 1)   f32
    # w_ref:   (1, TC)   f32  (2*pi already folded in; column block j % nj_half)
    # out_ref: (TB, TC)  out_dtype
    j = pl.program_id(1)
    proj = x_ref[...] * w_ref[...]                    # (TB, TC) VPU broadcast multiply (f32)

    @pl.when(j < nj_half)
    def _():
        out_ref[...] = jnp.sin(proj).astype(out_ref.dtype)

    @pl.when(j >= nj_half)
    def _():
        out_ref[...] = jnp.cos(proj).astype(out_ref.dtype)


def _gfp_kernel_full(x_ref, w_ref, out_ref):
    # Fallback path (E/2 not a multiple of 128): full-width output block.
    # x_ref:   (TB, 1)        f32
    # w_ref:   (1, HALF)      f32
    # out_ref: (TB, 2*HALF)   out_dtype  -- [:, :HALF] = sin, [:, HALF:] = cos
    half = w_ref.shape[1]
    proj = x_ref[...] * w_ref[...]                    # (TB, HALF) f32
    out_ref[:, :half] = jnp.sin(proj).astype(out_ref.dtype)
    out_ref[:, half:] = jnp.cos(proj).astype(out_ref.dtype)


def _round_up(n, m):
    return ((n + m - 1) // m) * m


def fold_two_pi(W):
    """One-time (init-time) fold of the 2*pi factor into the fixed weights.

    NOTE: apply exactly once to the raw checkpointed W; passing a raw W without
    folding (or folding twice on restore) silently changes the embedding.
    """
    return W.astype(jnp.float32) * jnp.float32(2.0 * math.pi)


def gaussian_fourier_projection(x, w2pi, *, out_dtype=jnp.float32):
    """x: (B,) noise levels, w2pi: (E/2,) = W * 2*pi  ->  (B, E) embedding.

    Math is always f32; `out_dtype=jnp.bfloat16` halves HBM writeback (cast at store).
    """
    B = x.shape[0]
    half = w2pi.shape[0]
    E = 2 * half
    out_itemsize = jnp.dtype(out_dtype).itemsize

    # Sublane-align the batch only (no whole-tile round-up; partial last tile is fine).
    row_align = 16 if out_itemsize < 4 else 8
    bp = _round_up(max(B, row_align), row_align)
    x2d = jnp.zeros((bp, 1), jnp.float32).at[:B, 0].set(x.astype(jnp.float32))
    w2d = w2pi.reshape(1, half).astype(jnp.float32)

    lane_dense = (half % 128 == 0)

    if lane_dense:
        # Column tile: largest of {512, 384, 256, 128} that divides E/2 (always >=128).
        for tc in (512, 384, 256, 128):
            if half % tc == 0:
                break
        nj_half = half // tc
        out_cols = tc
    else:
        out_cols = E  # single full-width block; masked stores, but no extra HBM pass

    # Row tile: keep the double-buffered output tile under ~12 MiB (plus the tiny x
    # tile) -> comfortably inside v5e/v6e 32 MiB scoped default and v7x 32/64 MiB.
    budget = 12 << 20
    tb_cap = max(row_align,
                 (budget // (2 * out_cols * out_itemsize)) // row_align * row_align)
    tb = min(4096, tb_cap, bp)

    if lane_dense:
        kern = functools.partial(_gfp_kernel_cols, nj_half=nj_half)
        grid = (pl.cdiv(bp, tb), 2 * nj_half)
        in_specs = [
            pl.BlockSpec((tb, 1), lambda i, j: (i, 0)),
            pl.BlockSpec((1, tc), lambda i, j: (0, j % nj_half)),
        ]
        out_specs = pl.BlockSpec((tb, tc), lambda i, j: (i, j))
        dim_sem = ("parallel", "parallel")   # row + column tiles shard across v7x TCs
    else:
        kern = _gfp_kernel_full
        grid = (pl.cdiv(bp, tb),)
        in_specs = [
            pl.BlockSpec((tb, 1), lambda i: (i, 0)),
            pl.BlockSpec((1, half), lambda i: (0, 0)),
        ]
        out_specs = pl.BlockSpec((tb, E), lambda i: (i, 0))
        dim_sem = ("parallel",)

    out = pl.pallas_call(
        kern,
        out_shape=jax.ShapeDtypeStruct((bp, E), out_dtype),
        grid_spec=pltpu.PrefetchScalarGridSpec(
            num_scalar_prefetch=0,
            grid=grid,
            in_specs=in_specs,
            out_specs=out_specs,
        ),
        compiler_params=pltpu.CompilerParams(dimension_semantics=dim_sem),
        cost_estimate=pl.CostEstimate(
            flops=bp * half,                              # one multiply per projected elem
            transcendentals=2 * bp * half,                # sin + cos
            bytes_accessed=(bp + half) * 4 + bp * E * out_itemsize,
        ),
    )(x2d, w2d)

    return out[:B]


if __name__ == "__main__":
    embedding_size = 256
    scale = 1.0

    key = jax.random.PRNGKey(0)
    kw, kx = jax.random.split(key)
    # Deterministic synthetic parameter: W = randn(embedding_size // 2) * scale
    W = jax.random.normal(kw, (embedding_size // 2,), dtype=jnp.float32) * scale
    # Init-time transform: fold 2*pi into the fixed (non-trainable) weights.
    W2pi = fold_two_pi(W)

    # --- check 1: small batch, f32 output (exact PyTorch semantics) -------------
    B = 8
    x = jax.random.uniform(kx, (B,), dtype=jnp.float32)
    emb = jax.block_until_ready(gaussian_fourier_projection(x, W2pi))
    x_proj = x[:, None] * W[None, :] * (2.0 * math.pi)
    ref = jnp.concatenate([jnp.sin(x_proj), jnp.cos(x_proj)], axis=-1)
    assert emb.shape == (B, embedding_size)
    assert jnp.allclose(emb, ref, atol=1e-5, rtol=1e-5)

    # --- check 2: batch not a multiple of 8 (exercises row padding/slicing) -----
    B2 = 20
    x2 = jax.random.uniform(jax.random.PRNGKey(1), (B2,), dtype=jnp.float32)
    emb2 = jax.block_until_ready(gaussian_fourier_projection(x2, W2pi))
    x_proj2 = x2[:, None] * W[None, :] * (2.0 * math.pi)
    ref2 = jnp.concatenate([jnp.sin(x_proj2), jnp.cos(x_proj2)], axis=-1)
    assert emb2.shape == (B2, embedding_size)
    assert jnp.allclose(emb2, ref2, atol=1e-5, rtol=1e-5)

    # --- check 3: bf16 output option (f32 math, cast at store) ------------------
    emb_bf16 = jax.block_until_ready(
        gaussian_fourier_projection(x, W2pi, out_dtype=jnp.bfloat16))
    assert emb_bf16.dtype == jnp.bfloat16
    assert jnp.allclose(emb_bf16.astype(jnp.float32), ref, atol=1e-2, rtol=1e-2)

    print("KERNEL_OK")
</pallas_src>

<mosaic_0001>
module attributes {stable_mosaic.version = 11 : i64} {
  func.func @_gfp_kernel_cols(%arg0: i32, %arg1: i32, %arg2: memref<8x1xf32, #tpu.memory_space<vmem>>, %arg3: memref<1x128xf32, #tpu.memory_space<vmem>>, %arg4: memref<8x128xf32, #tpu.memory_space<vmem>>) attributes {dimension_semantics = [#tpu.dimension_semantics<parallel>, #tpu.dimension_semantics<parallel>], iteration_bounds = array<i64: 1, 2>, scalar_prefetch = 0 : i64, scratch_operands = 0 : i64, tpu.core_type = #tpu.core_type<tc>, window_params = [{transform_indices = @transform_0, window_bounds = array<i64: 8, 1>}, {transform_indices = @transform_1, window_bounds = array<i64: 1, 128>}, {transform_indices = @transform_2, window_bounds = array<i64: 8, 128>}]} {
    %c0 = arith.constant 0 : index
    %c0_0 = arith.constant 0 : index
    %0 = vector.load %arg2[%c0, %c0_0] : memref<8x1xf32, #tpu.memory_space<vmem>>, vector<8x1xf32>
    %c0_1 = arith.constant 0 : index
    %c0_2 = arith.constant 0 : index
    %1 = vector.load %arg3[%c0_1, %c0_2] : memref<1x128xf32, #tpu.memory_space<vmem>>, vector<1x128xf32>
    %2 = vector.broadcast %0 : vector<8x1xf32> to vector<8x128xf32>
    %3 = vector.broadcast %1 : vector<1x128xf32> to vector<8x128xf32>
    %4 = arith.mulf %2, %3 : vector<8x128xf32>
    %c1_i32 = arith.constant 1 : i32
    %5 = arith.cmpi slt, %arg1, %c1_i32 : i32
    %6 = arith.extui %5 : i1 to i32
    %c0_i32 = arith.constant 0 : i32
    %7 = arith.cmpi ne, %6, %c0_i32 : i32
    scf.if %7 {
      %11 = math.sin %4 : vector<8x128xf32>
      %c0_5 = arith.constant 0 : index
      %c0_6 = arith.constant 0 : index
      %12 = vector.load %arg4[%c0_5, %c0_6] : memref<8x128xf32, #tpu.memory_space<vmem>>, vector<8x128xf32>
      tpu.vector_store %arg4[%c0_5, %c0_6], %11 {strides = array<i32>} : memref<8x128xf32, #tpu.memory_space<vmem>>, vector<8x128xf32>,
    } else {
    }
    %c1_i32_3 = arith.constant 1 : i32
    %8 = arith.cmpi sge, %arg1, %c1_i32_3 : i32
    %9 = arith.extui %8 : i1 to i32
    %c0_i32_4 = arith.constant 0 : i32
    %10 = arith.cmpi ne, %9, %c0_i32_4 : i32
    scf.if %10 {
      %11 = math.cos %4 : vector<8x128xf32>
      %c0_5 = arith.constant 0 : index
      %c0_6 = arith.constant 0 : index
      %12 = vector.load %arg4[%c0_5, %c0_6] : memref<8x128xf32, #tpu.memory_space<vmem>>, vector<8x128xf32>
      tpu.vector_store %arg4[%c0_5, %c0_6], %11 {strides = array<i32>} : memref<8x128xf32, #tpu.memory_space<vmem>>, vector<8x128xf32>,
    } else {
    }
    return
  }
  func.func @transform_0(%arg0: i32, %arg1: i32) -> (i32, i32) {
    %c0_i32 = arith.constant 0 : i32
    %c0_i32_0 = arith.constant 0 : i32
    return %arg0, %c0_i32 : i32, i32
  }
  func.func @transform_1(%arg0: i32, %arg1: i32) -> (i32, i32) {
    %c1_i32 = arith.constant 1 : i32
    %c0_i32 = arith.constant 0 : i32
    %0 = arith.cmpi eq, %c1_i32, %c0_i32 : i32
    %c1_i32_0 = arith.constant 1 : i32
    %1 = arith.select %0, %c1_i32_0, %c1_i32 : i32
    %2 = arith.remsi %arg1, %1 : i32
    %c0_i32_1 = arith.constant 0 : i32
    %3 = arith.cmpi ne, %2, %c0_i32_1 : i32
    %c0_i32_2 = arith.constant 0 : i32
    %4 = arith.cmpi slt, %2, %c0_i32_2 : i32
    %c0_i32_3 = arith.constant 0 : i32
    %5 = arith.cmpi slt, %1, %c0_i32_3 : i32
    %6 = arith.xori %4, %5 : i1
    %7 = arith.andi %6, %3 : i1
    %8 = arith.addi %2, %1 : i32
    %9 = arith.select %7, %8, %2 : i32
    %c0_i32_4 = arith.constant 0 : i32
    %c0_i32_5 = arith.constant 0 : i32
    return %c0_i32_4, %9 : i32, i32
  }
  func.func @transform_2(%arg0: i32, %arg1: i32) -> (i32, i32) {
    %c0_i32 = arith.constant 0 : i32
    return %arg0, %arg1 : i32, i32
  }
}

</mosaic_0001>

<bundles_post_ra>
// kernel: tpu_custom_call.1
= control target key start
LH: loop header
LB: loop body
LE: loop exit
PB: predicated region body
PF: predicated region fallthrough
CT: control target
= control target key end

     0   :  { %7 = vsyncpa [#allocation3], 0  ;;  %s845_s0 = inlined_call_operand.vmem [shape: f32[8,1], index: 0, kind: input, shape index: {}]   ;;  %s846_s1 = inlined_call_operand.vmem [shape: f32[1,128], index: 1, kind: input, shape index: {}]   ;;  %s847_s2 = inlined_call_operand.hbm [shape: f32[8,256], index: 2, kind: output, shape index: {}]  }
   0x1   :  { %9 = vsyncpa [#allocation3 + $0x1], 0  ;;  %s687_s9 = smov 0   ;;  %s689_s10 = smov 0  }
   0x2   :  { %s691_s11 = smov 0   ;;  %s693_s12 = smov 0  }
   0x3   :  { %s695_s13 = smov 0   ;;  %s697_s14 = smov 0  }
   0x4 LB: > { %s472_s15 = sadd.s32 4294967295, %s656_s14   ;;  %s473_s16 = sadd.s32 4294967294, %s656_s14   ;;  %s656_s14 = sphi %s697_s14, %s15_s14   ;;  %s652_s13 = sphi %s695_s13, %s854_s13   ;;  %s648_s12 = sphi %s693_s12, %s853_s12   ;;  %s644_s11 = sphi %s691_s11, %s852_s11   ;;  %s640_s10 = sphi %s689_s10, %s851_s10   ;;  %s636_s9 = sphi %s687_s9, %s850_s9  }
   0x5   : > { %s24_s17 = sadd.s32 1, %s652_s13  ;;  %s83_s18 = sadd.s32 1, %s644_s11 }
   0x6   : > { %p25_p0 = scmp.ge.s32.totalorder %s24_s17, 2  ;;  %p93_p1 = scmp.ne.s32.totalorder %s644_s11, %s640_s10 }
   0x7   : > { %p94_p2 = scmp.eq.s32.totalorder %s472_s15, 1  ;;  %p99_p3 = scmp.ne.s32.totalorder %s640_s10, %s636_s9 }
   0x8   : > { %s856_s17 = smov (%p25_p0, %s24_s17), 0  ;;  %p100_p5 = scmp.eq.s32.totalorder %s473_s16, 1 }
   0x9   : > { %p727_p4 = por %p94_p2, %p93_p1  ;;  %s79_s20 = ssub.s32 %s652_s13, %s856_s17 }
   0xa   : > { %p476_p6 = scmp.ge.s32.totalorder %s656_s14, 1  ;;  %p81_p7 = scmp.eq.s32.totalorder %s79_s20, 0 }
   0xb   : > { %p734_p8 = por %p100_p5, %p99_p3  ;;  %p128_p9 = scmp.lt.s32.totalorder %s656_s14, 3 }
   0xc   : > { %s740_s22 = scalar_select %p81_p7, %s644_s11, %s83_s18  }
   0xd   : > { %p129_p10 = pnand %p476_p6, %p128_p9 }
   0xe   : > { %v153_v0 = vld [vmem:[%s845_s0] sm:$0xff] (!%p129_p10)  ;;  %s146_s25 = sand.u32 (!%p129_p10), 1, %s640_s10   ;;  %v658_v1 = vmov (!%p129_p10), 0   ;;  %p479_p11 = scmp.ge.s32.totalorder (!%p129_p10), %s648_s12, 1 }
   0xf   : > { %132 = sbr.rel (%p129_p10) target bundleno = 333 (0x14d), region = 28  ;;  %569 = vset.pattern.permute.xlu0 (!%p129_p10), %v658_v1  ;;  %s477_s26 = sshll.u32 (!%p129_p10), %s146_s25, 3  ;;  %v478_v2 = vld [vmem:[%s846_s1] ss:$0 sm:$0xff] (!%p129_p10) }
  0x10   : > { %157 = vperm.xlu0 (!%p129_p10), %569, %v153_v0   ;;  %s753_s29 = scalar_lea.vmem (!%p129_p10), [#allocation2], %s477_s26 }
  0x16   : > { %v659_v16 = vmov (!%p479_p11), 683565275   ;;  %v660_v18 = vmov (!%p479_p11), 2475754826   ;;  %v661_v20 = vmov (!%p479_p11), 2131351028  }
  0x17   : > { %v662_v22 = vmov (!%p479_p11), 2102212464   ;;  %v663_v24 = vmov (!%p479_p11), 920167782   ;;  %v664_v31 = vmov (!%p479_p11), 1326507024  }
  0x8a   : > { %170 = sbr.rel (%p479_p11) target bundleno = 227 (0xe3), region = 32 }
  0x8f   : > { %v158_v3 = vpop.permute.xlu0 %157 }
  0x90   : > { %v751_v4 = vmul.f32 %v478_v2, %v158_v3 }
  0x92   : > { %v174_v5 = vand.u32 2139095040, %v751_v4  ;;  %v171_v7 = vand.u32 2147483647, %v751_v4  ;;  %vm173_vm7 = vcmp.lt.s32.totalorder %v751_v4, 0  ;;  %vm263_vm12 = vweird.f32 %v751_v4 }
  0x94   : > { %v175_v6 = vshrl.u32 %v174_v5, 23  ;;  %v178_v10 = vand.u32 8388607, %v171_v7  ;;  %vm172_vm8 = vcmp.le.f32.partialorder %v171_v7, 0.7853982 }
  0x96   : > { %v480_v8 = vadd.s32 4294967169, %v175_v6  ;;  %v179_v13 = vor.u32 8388608, %v178_v10 }
  0x98   : > { %v181_v9 = vadd.s32 1, %v480_v8  ;;  %v219_v33 = vshll.u32 %v179_v13, 8 }
  0x9a   : > { %vm182_vm0 = vcmp.gt.s32.totalorder %v181_v9, 0 }
  0x9b   : > { %v183_v11 = vsel %vm182_vm0, %v181_v9, 0 }
  0x9c   : > { %v185_v12 = vand.u32 31, %v183_v11  ;;  %v184_v14 = vshrl.u32 %v183_v11, 5 }
  0x9e   : > { %v186_v15 = vsub.s32 32, %v185_v12  ;;  %v188_v17 = vshll.u32 %v659_v16, %v185_v12  ;;  %v191_v19 = vshll.u32 %v660_v18, %v185_v12  ;;  %v194_v21 = vshll.u32 %v661_v20, %v185_v12 }
  0x9f   : > { %v197_v23 = vshll.u32 %v662_v22, %v185_v12  ;;  %v200_v25 = vshll.u32 %v663_v24, %v185_v12  ;;  %vm203_vm1 = vcmp.lt.s32.totalorder %v184_v14, 1  ;;  %vm206_vm2 = vcmp.lt.s32.totalorder %v184_v14, 4 }
  0xa0   : > { %v187_v26 = vshrl.u32 %v659_v16, %v186_v15  ;;  %v189_v27 = vshrl.u32 %v660_v18, %v186_v15  ;;  %v192_v28 = vshrl.u32 %v661_v20, %v186_v15  ;;  %v195_v29 = vshrl.u32 %v662_v22, %v186_v15 }
  0xa1   : > { %v198_v30 = vshrl.u32 %v663_v24, %v186_v15  ;;  %v201_v32 = vshrl.u32 %v664_v31, %v186_v15  ;;  %vm204_vm3 = vcmp.lt.s32.totalorder %v184_v14, 2  ;;  %vm205_vm4 = vcmp.lt.s32.totalorder %v184_v14, 3 }
  0xa2   : > { %v190_v34 = vor.u32 %v189_v27, %v188_v17  ;;  %v193_v35 = vor.u32 %v192_v28, %v191_v19  ;;  %v196_v36 = vor.u32 %v195_v29, %v194_v21 }
  0xa3   : > { %v199_v37 = vor.u32 %v198_v30, %v197_v23  ;;  %v202_v38 = vor.u32 %v201_v32, %v200_v25 }
  0xa4   : > { %v207_v39 = vsel %vm203_vm1, %v187_v26, %v190_v34  ;;  %v208_v40 = vsel %vm206_vm2, %v196_v36, 2102212464  ;;  %v211_v41 = vsel %vm203_vm1, %v190_v34, %v193_v35  ;;  %v215_v42 = vsel %vm203_vm1, %v193_v35, %v196_v36 }
  0xa5   : > { %v209_v43 = vsel %vm205_vm4, %v193_v35, %v208_v40  ;;  %v212_v44 = vsel %vm206_vm2, %v199_v37, 920167782  ;;  %v216_v45 = vsel %vm206_vm2, %v202_v38, 1326507024 }
  0xa6   : > { %v213_v46 = vsel %vm205_vm4, %v196_v36, %v212_v44  ;;  %v217_v47 = vsel %vm205_vm4, %v199_v37, %v216_v45  ;;  %v210_v48 = vsel %vm204_vm3, %v207_v39, %v209_v43 }
  0xa7   : > { %v214_v49 = vsel %vm204_vm3, %v211_v41, %v213_v46  ;;  %v218_v50 = vsel %vm204_vm3, %v215_v42, %v217_v47  ;;  %v226_v55 = vmul.u32 %v219_v33, %v210_v48 }
  0xa8   : > { %v760_v51 = vmul.u32.u64.low %v219_v33, %v218_v50  ;;  %v761_v52 = vmul.u32.u64.high %v219_v33, %v218_v50, %v760_v51  ;;  %v763_v53 = vmul.u32.u64.low %v219_v33, %v214_v49  ;;  %v764_v54 = vmul.u32.u64.high %v219_v33, %v214_v49, %v763_v53 }
  0xaa   : > { %vm228_vm5 = vc.u32 %v761_v52, %v763_v53  ;;  %v229_v56 = vadd.s32 1, %v764_v54  ;;  %v227_v3 = vadd.s32 %v763_v53, %v761_v52 }
  0xac   : > { %v230_v57 = vsel %vm228_vm5, %v229_v56, %v764_v54 }
  0xad   : > { %v231_v58 = vadd.s32 %v230_v57, %v226_v55 }
  0xaf   : > { %v232_v59 = vadd.s32 536870912, %v231_v58 }
  0xb1   : > { %v233_v60 = vshrl.u32 %v232_v59, 30 }
  0xb3   : > { %v234_v61 = vshll.u32 %v233_v60, 30  ;;  %v257_v17 = vsub.s32 4, %v233_v60 }
  0xb5   : > { %v235_v62 = vsub.s32 %v231_v58, %v234_v61  ;;  %v258_v20 = vsel %vm173_vm7, %v257_v17, %v233_v60 }
  0xb6   : > { %v260_v23 = vsel %vm172_vm8, 0, %v258_v20 }
  0xb7   : > { %v237_v63 = vsub.s32 0, %v235_v62  ;;  %v264_v24 = vadd.s32 3, %v260_v23 }
  0xb9   : > { %v481_v0 = vmin.u32 %v237_v63, %v235_v62  ;;  %v265_v25 = vand.u32 3, %v264_v24 }
  0xbb   : > { %v239_v1 = vclz %v481_v0  ;;  %vm270_vm9 = vcmp.eq.s32.totalorder %v265_v25, 2  ;;  %vm267_vm10 = vcmp.eq.s32.totalorder %v265_v25, 0  ;;  %vm266_vm11 = vcmp.lt.s32.totalorder %v265_v25, 2 }
  0xbd   : > { %v482_v2 = vadd.s32 4294967294, %v239_v1 }
  0xbf   : > { %vm483_vm6 = vcmp.lt.s32.totalorder %v482_v2, 0 }
  0xc0   : > { %v242_v5 = vsel %vm483_vm6, 0, %v482_v2 }
  0xc1   : > { %v243_v6 = vsub.s32 32, %v242_v5  ;;  %v244_v8 = vshll.u32 %v235_v62, %v242_v5  ;;  %v247_v9 = vsub.s32 4294967266, %v242_v5 }
  0xc3   : > { %v245_v10 = vshrl.u32 %v227_v3, %v243_v6  ;;  %v248_v11 = vadd.s32 127, %v247_v9 }
  0xc5   : > { %v246_v12 = vor.u32 %v245_v10, %v244_v8  ;;  %v249_v13 = vshll.u32 %v248_v11, 23 }
  0xc7   : > { %v250_v14 = vor.u32 4788187, %v249_v13  ;;  %v253_v15 = vcvt.s32.f32 %v246_v12 }
  0xc9   : > { %v251_v16 = vand.u32 2147483647, %v250_v14 }
  0xcb   : > { %v254_v18 = vmul.f32 %v253_v15, %v251_v16 }
  0xcd   : > { %v255_v19 = vxor.u32 2147483648, %v254_v18 }
  0xcf   : > { %v256_v21 = vsel %vm173_vm7, %v255_v19, %v254_v18 }
  0xd0   : > { %v259_v22 = vsel %vm172_vm8, %v751_v4, %v256_v21 }
  0xd1   : > { %570 = vcosq.f32 %v259_v22 }
  0xd2   : > { %572 = vsinq.f32 %v259_v22 }
  0xdb   : > { %v571_v26 = vpop.eup %570 }
  0xdc   : > { %v573_v27 = vpop.eup %572  ;;  %v271_v28 = vxor.u32 2147483648, %v571_v26 }
  0xdd   : > { %v268_v29 = vxor.u32 2147483648, %v573_v27 }
  0xde   : > { %v272_v7 = vsel %vm270_vm9, %v271_v28, %v573_v27 }
  0xdf   : > { %v269_v30 = vsel %vm267_vm10, %v571_v26, %v268_v29 }
  0xe0   : > { %v273_v31 = vsel %vm266_vm11, %v269_v30, %v272_v7 }
  0xe1   : > { %v274_v32 = vsel %vm263_vm12, nan, %v273_v31 }
  0xe2   : > { %275 = vst [vmem:[%s753_s29] sm:$0xff] %v274_v32 }
  0xe3 PF: > { %p484_p12 = scmp.lt.s32.totalorder %s648_s12, 1 }
  0xe4   : > { %v283_v33 = vand.u32 (!%p484_p12), 2139095040, %v751_v4  ;;  %v280_v35 = vand.u32 (!%p484_p12), 2147483647, %v751_v4  ;;  %v665_v44 = vmov (!%p484_p12), 683565275   ;;  %vm282_vm4 = vcmp.lt.s32.totalorder (!%p484_p12), %v751_v4, 0 }
  0xe5   : > { %279 = sbr.rel (%p484_p12) target bundleno = 309 (0x135), region = 36  ;;  %v666_v46 = vmov (!%p484_p12), 2475754826   ;;  %v667_v48 = vmov (!%p484_p12), 2131351028   ;;  %vm372_vm9 = vweird.f32 (!%p484_p12), %v751_v4 }
  0xe6   : > { %v284_v34 = vshrl.u32 (!%p484_p12), %v283_v33, 23  ;;  %v287_v38 = vand.u32 (!%p484_p12), 8388607, %v280_v35  ;;  %v668_v50 = vmov (!%p484_p12), 2102212464  }
  0xe7   : > { %v669_v52 = vmov (!%p484_p12), 920167782   ;;  %v670_v59 = vmov (!%p484_p12), 1326507024   ;;  %vm281_vm5 = vcmp.le.f32.partialorder (!%p484_p12), %v280_v35, 0.7853982 }
  0xe8   : > { %v485_v36 = vadd.s32 (!%p484_p12), 4294967169, %v284_v34  ;;  %v288_v41 = vor.u32 (!%p484_p12), 8388608, %v287_v38 }
  0xea   : > { %v290_v37 = vadd.s32 (!%p484_p12), 1, %v485_v36  ;;  %v328_v61 = vshll.u32 (!%p484_p12), %v288_v41, 8 }
  0xec   : > { %vm291_vm13 = vcmp.gt.s32.totalorder %v290_v37, 0 }
  0xed   : > { %v292_v39 = vsel %vm291_vm13, %v290_v37, 0 }
  0xee   : > { %v294_v40 = vand.u32 31, %v292_v39  ;;  %v293_v42 = vshrl.u32 %v292_v39, 5 }
  0xf0   : > { %v295_v43 = vsub.s32 32, %v294_v40  ;;  %v297_v45 = vshll.u32 %v665_v44, %v294_v40  ;;  %v300_v47 = vshll.u32 %v666_v46, %v294_v40  ;;  %v303_v49 = vshll.u32 %v667_v48, %v294_v40 }
  0xf1   : > { %v306_v51 = vshll.u32 %v668_v50, %v294_v40  ;;  %v309_v53 = vshll.u32 %v669_v52, %v294_v40  ;;  %vm312_vm14 = vcmp.lt.s32.totalorder %v293_v42, 1  ;;  %vm315_vm15 = vcmp.lt.s32.totalorder %v293_v42, 4 }
  0xf2   : > { %v296_v54 = vshrl.u32 %v665_v44, %v295_v43  ;;  %v298_v55 = vshrl.u32 %v666_v46, %v295_v43  ;;  %v301_v56 = vshrl.u32 %v667_v48, %v295_v43  ;;  %v304_v57 = vshrl.u32 %v668_v50, %v295_v43 }
  0xf3   : > { %v307_v58 = vshrl.u32 %v669_v52, %v295_v43  ;;  %v310_v60 = vshrl.u32 %v670_v59, %v295_v43  ;;  %vm313_vm0 = vcmp.lt.s32.totalorder %v293_v42, 2  ;;  %vm314_vm1 = vcmp.lt.s32.totalorder %v293_v42, 3 }
  0xf4   : > { %v299_v62 = vor.u32 %v298_v55, %v297_v45  ;;  %v302_v63 = vor.u32 %v301_v56, %v300_v47  ;;  %v305_v0 = vor.u32 %v304_v57, %v303_v49 }
  0xf5   : > { %v308_v1 = vor.u32 %v307_v58, %v306_v51  ;;  %v311_v2 = vor.u32 %v310_v60, %v309_v53 }
  0xf6   : > { %v316_v3 = vsel %vm312_vm14, %v296_v54, %v299_v62  ;;  %v317_v5 = vsel %vm315_vm15, %v305_v0, 2102212464  ;;  %v320_v6 = vsel %vm312_vm14, %v299_v62, %v302_v63  ;;  %v324_v8 = vsel %vm312_vm14, %v302_v63, %v305_v0 }
  0xf7   : > { %v318_v9 = vsel %vm314_vm1, %v302_v63, %v317_v5  ;;  %v321_v10 = vsel %vm315_vm15, %v308_v1, 920167782  ;;  %v325_v11 = vsel %vm315_vm15, %v311_v2, 1326507024 }
  0xf8   : > { %v322_v12 = vsel %vm314_vm1, %v305_v0, %v321_v10  ;;  %v326_v13 = vsel %vm314_vm1, %v308_v1, %v325_v11  ;;  %v319_v14 = vsel %vm313_vm0, %v316_v3, %v318_v9 }
  0xf9   : > { %v323_v15 = vsel %vm313_vm0, %v320_v6, %v322_v12  ;;  %v327_v16 = vsel %vm313_vm0, %v324_v8, %v326_v13  ;;  %v335_v21 = vmul.u32 %v328_v61, %v319_v14 }
  0xfa   : > { %v781_v17 = vmul.u32.u64.low %v328_v61, %v327_v16  ;;  %v782_v18 = vmul.u32.u64.high %v328_v61, %v327_v16, %v781_v17  ;;  %v784_v19 = vmul.u32.u64.low %v328_v61, %v323_v15  ;;  %v785_v20 = vmul.u32.u64.high %v328_v61, %v323_v15, %v784_v19 }
  0xfc   : > { %vm337_vm2 = vc.u32 %v782_v18, %v784_v19  ;;  %v338_v22 = vadd.s32 1, %v785_v20  ;;  %v336_v32 = vadd.s32 %v784_v19, %v782_v18 }
  0xfe   : > { %v339_v23 = vsel %vm337_vm2, %v338_v22, %v785_v20 }
  0xff   : > { %v340_v24 = vadd.s32 %v339_v23, %v335_v21 }
 0x101   : > { %v341_v25 = vadd.s32 536870912, %v340_v24 }
 0x103   : > { %v342_v26 = vshrl.u32 %v341_v25, 30 }
 0x105   : > { %v343_v27 = vshll.u32 %v342_v26, 30  ;;  %v366_v47 = vsub.s32 4, %v342_v26 }
 0x107   : > { %v344_v28 = vsub.s32 %v340_v24, %v343_v27  ;;  %v367_v50 = vsel %vm282_vm4, %v366_v47, %v342_v26 }
 0x108   : > { %v369_v51 = vsel %vm281_vm5, 0, %v367_v50 }
 0x109   : > { %v346_v29 = vsub.s32 0, %v344_v28  ;;  %v373_v52 = vand.u32 3, %v369_v51 }
 0x10b   : > { %v486_v7 = vmin.u32 %v346_v29, %v344_v28  ;;  %vm378_vm6 = vcmp.eq.s32.totalorder %v373_v52, 2  ;;  %vm375_vm7 = vcmp.eq.s32.totalorder %v373_v52, 0  ;;  %vm374_vm8 = vcmp.lt.s32.totalorder %v373_v52, 2 }
 0x10d   : > { %v348_v30 = vclz %v486_v7 }
 0x10f   : > { %v487_v31 = vadd.s32 4294967294, %v348_v30 }
 0x111   : > { %vm488_vm3 = vcmp.lt.s32.totalorder %v487_v31, 0 }
 0x112   : > { %v351_v33 = vsel %vm488_vm3, 0, %v487_v31 }
 0x113   : > { %v352_v34 = vsub.s32 32, %v351_v33  ;;  %v353_v36 = vshll.u32 %v344_v28, %v351_v33  ;;  %v356_v37 = vsub.s32 4294967266, %v351_v33 }
 0x115   : > { %v354_v38 = vshrl.u32 %v336_v32, %v352_v34  ;;  %v357_v39 = vadd.s32 127, %v356_v37 }
 0x117   : > { %v355_v40 = vor.u32 %v354_v38, %v353_v36  ;;  %v358_v41 = vshll.u32 %v357_v39, 23 }
 0x119   : > { %v359_v42 = vor.u32 4788187, %v358_v41  ;;  %v362_v43 = vcvt.s32.f32 %v355_v40 }
 0x11b   : > { %v360_v44 = vand.u32 2147483647, %v359_v42 }
 0x11d   : > { %v363_v45 = vmul.f32 %v362_v43, %v360_v44 }
 0x11f   : > { %v364_v46 = vxor.u32 2147483648, %v363_v45 }
 0x121   : > { %v365_v48 = vsel %vm282_vm4, %v364_v46, %v363_v45 }
 0x122   : > { %v368_v49 = vsel %vm281_vm5, %v751_v4, %v365_v48 }
 0x123   : > { %574 = vcosq.f32 %v368_v49 }
 0x124   : > { %576 = vsinq.f32 %v368_v49 }
 0x12d   : > { %v575_v53 = vpop.eup %574 }
 0x12e   : > { %v577_v54 = vpop.eup %576  ;;  %v379_v55 = vxor.u32 2147483648, %v575_v53 }
 0x12f   : > { %v376_v56 = vxor.u32 2147483648, %v577_v54 }
 0x130   : > { %v380_v35 = vsel %vm378_vm6, %v379_v55, %v577_v54 }
 0x131   : > { %v377_v57 = vsel %vm375_vm7, %v575_v53, %v376_v56 }
 0x132   : > { %v381_v58 = vsel %vm374_vm8, %v377_v57, %v380_v35 }
 0x133   : > { %v382_v59 = vsel %vm372_vm9, nan, %v381_v58 }
 0x134   : > { %383 = vst [vmem:[%s753_s29] sm:$0xff] %v382_v59 }
 0x135 PF: > { %s490_s30 = sshll.u32 %s648_s12, 7  ;;  %s400_s6 = sshll.u32 %s753_s29, 4  ;;  %s401_s6 = int_to_ptr.vmem [resolvable:$true] %s400_s6 }
 0x136   : > { %s801_s5 = scalar_lea.hbm %s847_s2, %s490_s30  ;;  %s385_s7 = scalar_lea.sflag [#allocation3], %s146_s25 }
 0x137   : > { %s578_s8 = scalar_lea.vmem %s401_s6, 128  ;;  %s671_s15 = smov [#allocation2]  }
 0x138   : > { %p579_p13 = scmp.ne.s32.totalorder %s401_s6, %s578_s8  ;;  %s582_s16 = sshll.u32 %s671_s15, 4  ;;  %s583_s16 = int_to_ptr.vmem [resolvable:$false] %s582_s16 }
 0x139   : > { %s584_s18 = scalar_lea.vmem %s583_s16, 256  ;;  %p585_p2 = scmp.lt.s32.totalorder %s401_s6, %s583_s16 }
 0x13a   : > { %p580_p0 = pnand %p579_p13, %p727_p4  ;;  %p586_p3 = scmp.lt.s32.totalorder %s584_s18, %s578_s8 }
 0x13c   : > { %p581_p1 = pneg %p580_p0  ;;  %p587_p5 = por %p586_p3, %p585_p2 }
 0x13e   : > { %p588_p6 = pnand %p587_p5, %p581_p1 }
 0x140   : > { %591 = shalt.err (!%p588_p6)
}
 0x141   : > { %s592_s12 = scalar_lea.hbm %s801_s5, 128  ;;  %s596_s24 = scalar_lea.hbm %s847_s2, 256 }
 0x142   : > { %p593_p7 = scmp.ne.s32.totalorder %s801_s5, %s592_s12  ;;  %p597_p11 = scmp.lt.u32.totalorder %s801_s5, %s847_s2 }
 0x143   : > { %p598_p12 = scmp.lt.u32.totalorder %s596_s24, %s592_s12  ;;  %p600_p0 = scmp.lt.u32.totalorder %s592_s12, %s801_s5 }
 0x144   : > { %p594_p9 = pnand %p593_p7, %p727_p4 }
 0x145   : > { %p599_p13 = por %p598_p12, %p597_p11 }
 0x146   : > { %p595_p10 = pneg %p594_p9 }
 0x147   : > { %p601_p1 = por %p600_p0, %p599_p13 }
 0x149   : > { %p602_p2 = pnand %p601_p1, %p595_p10 }
 0x14b   : > { %605 = shalt.err (!%p602_p2)
}
 0x14c   : > { %501 = dma.vmem_to_hbm [thread:$0]  (%p727_p4), %s401_s6, 128, %s801_s5, %s385_s7  }
 0x14d PF: > { %p507_p3 = scmp.ge.s32.totalorder %s656_s14, 2  ;;  %s412_s27 = sand.u32 1, %s636_s9  }
 0x14e   : > { %s413_s28 = scalar_lea.sflag [#allocation3], %s412_s27 }
 0x14f   : > { %p504_p5 = pnand %p507_p3, %p734_p8 }
 0x151   : > { %631 = dma.done.wait (!%p504_p5), %s413_s28, 128  }
 0x152   : > { %633 = vsyncadd (!%p504_p5), %s413_s28, 4294967168  ;;  %s15_s14 = sadd.s32 1, %s656_s14   ;;  %s850_s9 = smov %s640_s10 }
 0x153   : > { %p12_p6 = scmp.ge.s32.totalorder %s15_s14, 4   ;;  %s851_s10 = smov %s644_s11 }
 0x154   : > { %s852_s11 = smov %s740_s22  ;;  %s853_s12 = smov %s652_s13 }
 0x155   : > { %s854_s13 = smov %s856_s17  ;;  %14 = sbr.rel (!%p12_p6) target bundleno = 4 (0x4), region = 71 }
 0x15c   :  { %418 = vsyncpa [#allocation3], 1 }
 0x15d   :  { %420 = vsyncpa [#allocation3 + $0x1], 1 }

</bundles_post_ra>
